<compile_context>
chip_gen: v5e
topology: v5e:2x2
jax: 0.10.0
libtpu: 0.0.40
codegen_flags: <defaults>
</compile_context>

<pallas_src>
import math
import functools

import jax
import jax.numpy as jnp
from jax import lax
from jax.experimental import pallas as pl
from jax.experimental.pallas import tpu as pltpu


_INV_SQRT2 = 1.0 / math.sqrt(2.0)


def _round_up(n, m):
    return ((n + m - 1) // m) * m


def _cdiv(a, b):
    return -(-a // b)


def _spec(shape, index_map, single_buffer=False):
    """BlockSpec; constant-index blocks request a single (non-double) buffer."""
    if single_buffer and hasattr(pl, "Buffered"):
        try:
            return pl.BlockSpec(shape, index_map, pipeline_mode=pl.Buffered(1))
        except TypeError:
            pass
    return pl.BlockSpec(shape, index_map)


def _vmem_limit_bytes():
    # ~3/4 of physical per-core VMEM: ~48 MiB on v7x (64 MiB phys),
    # ~96 MiB on v5e/v6e (128 MiB phys). Leaves headroom for Mosaic scratch.
    try:
        phys = pltpu.get_tpu_info().vmem_capacity_bytes
    except Exception:
        phys = 64 * 1024 * 1024
    return int(phys * 3 // 4)


def _pick_h_tile(E_pad, H, tm, w_bytes, x_bytes, o_bytes, out_is_f32, budget):
    """Largest hidden tile whose VMEM footprint fits; prefer resident weights."""
    H128 = _round_up(H, 128)
    cands = [H128] + [t for t in (2048, 1024, 512, 256, 128) if t < H128]
    best = None
    for th in cands:
        H_pad = _round_up(H, th)
        n_h = H_pad // th
        resident = (n_h == 1)
        w_bufs = 1 if resident else 2
        need = (2 * E_pad * th * w_bytes * w_bufs        # W1 + W2 tiles
                + 2 * tm * E_pad * x_bytes               # x tile (double buffer)
                + 2 * tm * E_pad * o_bytes               # out tile (double buffer)
                + (0 if (resident or out_is_f32) else tm * E_pad * 4)  # acc
                + 2 * tm * th * 4)                       # GELU intermediate (rough)
        if need <= budget:
            return th, H_pad, True
        best = (th, H_pad)
    return best[0], best[1], False


def _ffn_kernel(x_ref, w1_ref, b1_ref, w2_ref, b2_ref, gamma_ref, beta_ref,
                o_ref, *scratch, eps, e_real, n_h_tiles, add_norm):
    """One (row-tile, hidden-tile) grid step.

    Grid = (rows_pad // tm, H_pad // th). Hidden axis (last, "arbitrary") is a
    reduction; rows ("parallel") shard across TensorCores.
    """
    # Matmul #1 in the weights' native dtype (bf16 weights -> native MXU path
    # on all gens); accumulation is always f32 via preferred_element_type.
    x = x_ref[...].astype(w1_ref.dtype)
    h = jnp.dot(x, w1_ref[...], preferred_element_type=jnp.float32)
    h = h + b1_ref[...].astype(jnp.float32)

    # Exact (erf) GELU, matching torch.nn.GELU() default.
    h = 0.5 * h * (1.0 + lax.erf(h * _INV_SQRT2))

    # Matmul #2, also fed in the weight dtype; accumulate in f32.
    h = h.astype(w2_ref.dtype)
    partial = jnp.dot(h, w2_ref[...], preferred_element_type=jnp.float32)

    if n_h_tiles == 1:
        acc_ref = None                      # no reduction -> no accumulator
    else:
        # f32 output: accumulate straight into the resident output block
        # (saves a (tm, E_pad) f32 scratch — matters on v7x's 64 MiB VMEM).
        # Non-f32 output: f32 VMEM scratch.
        acc_ref = scratch[0] if scratch else o_ref
        j = pl.program_id(1)

        @pl.when(j == 0)
        def _():
            acc_ref[...] = jnp.zeros_like(acc_ref)

        acc_ref[...] += partial

    def _finalize():
        acc = partial if acc_ref is None else acc_ref[...]
        b2f = b2_ref[...].astype(jnp.float32)

        # TODO(synk): nn.Dropout(p=0.1) is identity in eval mode; the
        # training-mode masked path (pltpu.prng_seed + prng_random_bits,
        # scaled by 1/(1-p)) is intentionally not emitted here.

        if not add_norm:
            o_ref[...] = (acc + b2f).astype(o_ref.dtype)
            return

        xf = x_ref[...].astype(jnp.float32)
        y = xf + acc + b2f

        e_pad = o_ref.shape[-1]
        inv_n = 1.0 / float(e_real)
        if e_real != e_pad:
            # emb was padded to a lane-dense multiple of 128: exclude the
            # padded lanes from the LayerNorm statistics.
            col = lax.broadcasted_iota(jnp.int32, y.shape, 1)
            mask = (col < e_real).astype(jnp.float32)
            y = y * mask
            mean = jnp.sum(y, axis=-1, keepdims=True) * inv_n
            centered = (y - mean) * mask
        else:
            mean = jnp.sum(y, axis=-1, keepdims=True) * inv_n
            centered = y - mean
        var = jnp.sum(centered * centered, axis=-1, keepdims=True) * inv_n
        normed = centered * lax.rsqrt(var + eps)
        result = (normed * gamma_ref[...].astype(jnp.float32)
                  + beta_ref[...].astype(jnp.float32))
        o_ref[...] = result.astype(o_ref.dtype)

    if n_h_tiles == 1:
        _finalize()
    else:
        pl.when(pl.program_id(1) == n_h_tiles - 1)(_finalize)


def feed_forward(x, w1, b1, w2, b2, gamma, beta, *, eps=1e-6, add_norm=True,
                 dropout_p=0.1, training=False, row_tile=512, h_tile=None):
    """x: (B, S, E). Returns LayerNorm(x + Linear2(GELU(Linear1(x)))) (eval mode)."""
    if training and dropout_p > 0.0:
        # TODO(synk): training-mode dropout path is not implemented in-kernel.
        raise NotImplementedError("FeedForward Pallas kernel is eval-mode only")

    B, S, E = x.shape
    H = w1.shape[1]
    rows = B * S

    E_pad = _round_up(E, 128)
    vmem_limit = _vmem_limit_bytes()
    budget = max(vmem_limit - 8 * 1024 * 1024, 8 * 1024 * 1024)

    # Row tile: large (amortizes grid-step overhead / weight streaming), but
    # always >= 2 row tiles so v7x's second TensorCore gets work.
    tm = _round_up(min(row_tile, max(rows, 8)), 8)
    if rows > 8 and _cdiv(rows, tm) < 2:
        tm = _round_up(_cdiv(rows, 2), 8)

    out_is_f32 = (x.dtype == jnp.float32)
    if h_tile is not None:
        th = _round_up(min(h_tile, H), 128)
        H_pad = _round_up(H, th)
    else:
        # Prefer fully-resident weights (th == H_pad): W1/W2 are DMA'd once
        # for the whole kernel instead of once per row tile.
        for _ in range(8):
            th, H_pad, ok = _pick_h_tile(
                E_pad, H, tm, w1.dtype.itemsize, x.dtype.itemsize,
                x.dtype.itemsize, out_is_f32, budget)
            if ok or tm <= 128:
                break
            tm = max(128, _round_up(tm // 2, 8))

    rows_pad = _round_up(rows, tm)
    n_h_tiles = H_pad // th
    resident = (n_h_tiles == 1)
    use_acc_scratch = (n_h_tiles > 1) and not out_is_f32

    # Pad only when needed (aligned shapes skip the extra HBM pass entirely).
    # TODO(synk): in production, pre-pad/reshape the weights once outside the
    # per-call hot path instead of per call.
    x2 = x.reshape(rows, E)
    if rows_pad != rows or E_pad != E:
        x2 = jnp.pad(x2, ((0, rows_pad - rows), (0, E_pad - E)))
    w1p = w1 if (E_pad == E and H_pad == H) else jnp.pad(
        w1, ((0, E_pad - E), (0, H_pad - H)))
    w2p = w2 if (E_pad == E and H_pad == H) else jnp.pad(
        w2, ((0, H_pad - H), (0, E_pad - E)))
    b1p = (b1 if H_pad == H else jnp.pad(b1, (0, H_pad - H))).reshape(1, H_pad)
    b2p = (b2 if E_pad == E else jnp.pad(b2, (0, E_pad - E))).reshape(1, E_pad)
    gp = (gamma if E_pad == E else jnp.pad(gamma, (0, E_pad - E))).reshape(1, E_pad)
    bp = (beta if E_pad == E else jnp.pad(beta, (0, E_pad - E))).reshape(1, E_pad)

    grid = (rows_pad // tm, n_h_tiles)

    in_specs = [
        pl.BlockSpec((tm, E_pad), lambda i, j: (i, 0)),                      # x rows
        _spec((E_pad, th),
              (lambda i, j: (0, 0)) if resident else (lambda i, j: (0, j)),
              single_buffer=resident),                                       # W1
        _spec((1, th),
              (lambda i, j: (0, 0)) if resident else (lambda i, j: (0, j)),
              single_buffer=resident),                                       # b1
        _spec((th, E_pad),
              (lambda i, j: (0, 0)) if resident else (lambda i, j: (j, 0)),
              single_buffer=resident),                                       # W2
        _spec((1, E_pad), lambda i, j: (0, 0), single_buffer=True),          # b2
        _spec((1, E_pad), lambda i, j: (0, 0), single_buffer=True),          # gamma
        _spec((1, E_pad), lambda i, j: (0, 0), single_buffer=True),          # beta
    ]

    scratch_shapes = ([pltpu.VMEM((tm, E_pad), jnp.float32)]
                      if use_acc_scratch else [])

    out = pl.pallas_call(
        functools.partial(_ffn_kernel, eps=eps, e_real=E,
                          n_h_tiles=n_h_tiles, add_norm=add_norm),
        out_shape=jax.ShapeDtypeStruct((rows_pad, E_pad), x.dtype),
        grid_spec=pltpu.PrefetchScalarGridSpec(
            num_scalar_prefetch=0,
            grid=grid,
            in_specs=in_specs,
            out_specs=pl.BlockSpec((tm, E_pad), lambda i, j: (i, 0)),
            scratch_shapes=scratch_shapes,
        ),
        compiler_params=pltpu.CompilerParams(
            dimension_semantics=("parallel", "arbitrary"),
            vmem_limit_bytes=vmem_limit,
        ),
    )(x2, w1p, b1p, w2p, b2p, gp, bp)

    if rows_pad != rows or E_pad != E:
        out = out[:rows, :E]
    return out.reshape(B, S, E)


def _reference(x, w1, b1, w2, b2, gamma, beta, eps=1e-6):
    h = jnp.dot(x, w1) + b1
    h = 0.5 * h * (1.0 + lax.erf(h / jnp.sqrt(2.0)))
    out = jnp.dot(h, w2) + b2
    y = x + out
    mean = jnp.mean(y, axis=-1, keepdims=True)
    var = jnp.mean((y - mean) ** 2, axis=-1, keepdims=True)
    return (y - mean) / jnp.sqrt(var + eps) * gamma + beta


def _make_params(key, E, H, dtype=jnp.float32):
    k_w1, k_b1, k_w2, k_b2 = jax.random.split(key, 4)
    bound1 = 1.0 / math.sqrt(E)
    w1 = jax.random.uniform(k_w1, (E, H), minval=-bound1, maxval=bound1, dtype=dtype)
    b1 = jax.random.uniform(k_b1, (H,), minval=-bound1, maxval=bound1, dtype=dtype)
    bound2 = 1.0 / math.sqrt(H)
    w2 = jax.random.uniform(k_w2, (H, E), minval=-bound2, maxval=bound2, dtype=dtype)
    b2 = jax.random.uniform(k_b2, (E,), minval=-bound2, maxval=bound2, dtype=dtype)
    gamma = jnp.ones((E,), dtype=dtype)   # nn.LayerNorm weight init
    beta = jnp.zeros((E,), dtype=dtype)   # nn.LayerNorm bias init
    return w1, b1, w2, b2, gamma, beta


if __name__ == "__main__":
    k_x, k_p, k_x2, k_p2, k_x3, k_p3 = jax.random.split(jax.random.PRNGKey(0), 6)

    # 1) Module-sized case (emb=32, hidden=64): lane padding + masked LayerNorm,
    #    resident weights (single hidden tile, no accumulator), 2 row tiles.
    B, S, E, H = 2, 8, 32, 64
    x = jax.random.normal(k_x, (B, S, E), dtype=jnp.float32)
    params = _make_params(k_p, E, H)
    y = jax.block_until_ready(feed_forward(x, *params))
    y_ref = _reference(x, *params)
    assert y.shape == (B, S, E)
    assert jnp.allclose(y, y_ref, atol=1e-4, rtol=1e-4), "mismatch (small f32)"

    # 2) Multi-hidden-tile f32: exercises the hidden-reduction grid with f32
    #    accumulation carried directly in the resident output block (no scratch).
    B2, S2, E2, H2 = 2, 256, 256, 512
    x2 = jax.random.normal(k_x2, (B2, S2, E2), dtype=jnp.float32)
    params2 = _make_params(k_p2, E2, H2)
    y2 = jax.block_until_ready(feed_forward(x2, *params2, h_tile=256))
    y2_ref = _reference(x2, *params2)
    assert y2.shape == (B2, S2, E2)
    assert jnp.allclose(y2, y2_ref, atol=1e-4, rtol=1e-4), "mismatch (f32 multi-tile)"

    # 3) bf16 end-to-end (native MXU dtype on all gens), multi hidden tile ->
    #    f32 VMEM scratch accumulator; bf16-appropriate tolerances vs f32 ref.
    B3, S3, E3, H3 = 2, 128, 256, 1024
    x3 = jax.random.normal(k_x3, (B3, S3, E3), dtype=jnp.float32).astype(jnp.bfloat16)
    params3 = tuple(p.astype(jnp.bfloat16) for p in _make_params(k_p3, E3, H3))
    y3 = jax.block_until_ready(feed_forward(x3, *params3, h_tile=512))
    y3_ref = _reference(x3.astype(jnp.float32),
                        *[p.astype(jnp.float32) for p in params3])
    diff = jnp.abs(y3.astype(jnp.float32) - y3_ref)
    assert y3.shape == (B3, S3, E3)
    assert float(jnp.mean(diff)) < 2e-2 and float(jnp.max(diff)) < 2.5e-1, \
        "mismatch (bf16)"

    print("KERNEL_OK")
</pallas_src>

<mosaic_0001>
module attributes {stable_mosaic.version = 11 : i64} {
  func.func @_ffn_kernel(%arg0: i32, %arg1: i32, %arg2: memref<8x128xf32, #tpu.memory_space<vmem>>, %arg3: memref<128x128xf32, #tpu.memory_space<vmem>>, %arg4: memref<1x128xf32, #tpu.memory_space<vmem>>, %arg5: memref<128x128xf32, #tpu.memory_space<vmem>>, %arg6: memref<1x128xf32, #tpu.memory_space<vmem>>, %arg7: memref<1x128xf32, #tpu.memory_space<vmem>>, %arg8: memref<1x128xf32, #tpu.memory_space<vmem>>, %arg9: memref<8x128xf32, #tpu.memory_space<vmem>>) attributes {dimension_semantics = [#tpu.dimension_semantics<parallel>, #tpu.dimension_semantics<arbitrary>], iteration_bounds = array<i64: 2, 1>, scalar_prefetch = 0 : i64, scratch_operands = 0 : i64, tpu.core_type = #tpu.core_type<tc>, window_params = [{transform_indices = @transform_0, window_bounds = array<i64: 8, 128>}, {pipeline_mode = #tpu.pipeline_mode<synchronous>, transform_indices = @transform_1, window_bounds = array<i64: 128, 128>}, {pipeline_mode = #tpu.pipeline_mode<synchronous>, transform_indices = @transform_2, window_bounds = array<i64: 1, 128>}, {pipeline_mode = #tpu.pipeline_mode<synchronous>, transform_indices = @transform_3, window_bounds = array<i64: 128, 128>}, {pipeline_mode = #tpu.pipeline_mode<synchronous>, transform_indices = @transform_4, window_bounds = array<i64: 1, 128>}, {pipeline_mode = #tpu.pipeline_mode<synchronous>, transform_indices = @transform_5, window_bounds = array<i64: 1, 128>}, {pipeline_mode = #tpu.pipeline_mode<synchronous>, transform_indices = @transform_6, window_bounds = array<i64: 1, 128>}, {transform_indices = @transform_7, window_bounds = array<i64: 8, 128>}]} {
    %c0 = arith.constant 0 : index
    %c0_0 = arith.constant 0 : index
    %0 = vector.load %arg2[%c0, %c0_0] : memref<8x128xf32, #tpu.memory_space<vmem>>, vector<8x128xf32>
    %c0_1 = arith.constant 0 : index
    %c0_2 = arith.constant 0 : index
    %1 = vector.load %arg3[%c0_1, %c0_2] : memref<128x128xf32, #tpu.memory_space<vmem>>, vector<128x128xf32>
    %cst = arith.constant dense<0.000000e+00> : vector<8x128xf32>
    %2 = tpu.matmul %0, %1, %cst {dimension_numbers = #tpu.dot_dimension_numbers<[1], [0], [0], [1], [0, 0, 1, 1], [], []>} : vector<8x128xf32>, vector<128x128xf32>, vector<8x128xf32> -> vector<8x128xf32>
    %c0_3 = arith.constant 0 : index
    %c0_4 = arith.constant 0 : index
    %3 = vector.load %arg4[%c0_3, %c0_4] : memref<1x128xf32, #tpu.memory_space<vmem>>, vector<1x128xf32>
    %4 = vector.broadcast %3 : vector<1x128xf32> to vector<8x128xf32>
    %5 = arith.addf %2, %4 : vector<8x128xf32>
    %cst_5 = arith.constant 5.000000e-01 : f32
    %6 = vector.broadcast %cst_5 : f32 to vector<8x128xf32>
    %7 = arith.mulf %6, %5 : vector<8x128xf32>
    %cst_6 = arith.constant 0.707106769 : f32
    %8 = vector.broadcast %cst_6 : f32 to vector<8x128xf32>
    %9 = arith.mulf %5, %8 : vector<8x128xf32>
    %10 = math.erf %9 : vector<8x128xf32>
    %cst_7 = arith.constant 1.000000e+00 : f32
    %11 = vector.broadcast %cst_7 : f32 to vector<8x128xf32>
    %12 = arith.addf %11, %10 : vector<8x128xf32>
    %13 = arith.mulf %7, %12 : vector<8x128xf32>
    %c0_8 = arith.constant 0 : index
    %c0_9 = arith.constant 0 : index
    %14 = vector.load %arg5[%c0_8, %c0_9] : memref<128x128xf32, #tpu.memory_space<vmem>>, vector<128x128xf32>
    %cst_10 = arith.constant dense<0.000000e+00> : vector<8x128xf32>
    %15 = tpu.matmul %13, %14, %cst_10 {dimension_numbers = #tpu.dot_dimension_numbers<[1], [0], [0], [1], [0, 0, 1, 1], [], []>} : vector<8x128xf32>, vector<128x128xf32>, vector<8x128xf32> -> vector<8x128xf32>
    %c0_11 = arith.constant 0 : index
    %c0_12 = arith.constant 0 : index
    %16 = vector.load %arg6[%c0_11, %c0_12] : memref<1x128xf32, #tpu.memory_space<vmem>>, vector<1x128xf32>
    %c0_13 = arith.constant 0 : index
    %c0_14 = arith.constant 0 : index
    %17 = vector.load %arg2[%c0_13, %c0_14] : memref<8x128xf32, #tpu.memory_space<vmem>>, vector<8x128xf32>
    %18 = arith.addf %17, %15 : vector<8x128xf32>
    %19 = vector.broadcast %16 : vector<1x128xf32> to vector<8x128xf32>
    %20 = arith.addf %18, %19 : vector<8x128xf32>
    %21 = tpu.iota {dimensions = array<i32: 1>} : vector<8x128xi32>
    %c32_i32 = arith.constant 32 : i32
    %22 = vector.broadcast %c32_i32 : i32 to vector<8x128xi32>
    %23 = arith.cmpi slt, %21, %22 : vector<8x128xi32>
    %24 = arith.extui %23 : vector<8x128xi1> to vector<8x128xi32>
    %25 = arith.sitofp %24 : vector<8x128xi32> to vector<8x128xf32>
    %26 = arith.mulf %20, %25 : vector<8x128xf32>
    %cst_15 = arith.constant dense<0.000000e+00> : vector<8xf32>
    %27 = vector.multi_reduction <add>, %26, %cst_15 [1] : vector<8x128xf32> to vector<8xf32>
    %28 = vector.shape_cast %27 : vector<8xf32> to vector<8x1xf32>
    %cst_16 = arith.constant 3.125000e-02 : f32
    %29 = vector.broadcast %cst_16 : f32 to vector<8x1xf32>
    %30 = arith.mulf %28, %29 : vector<8x1xf32>
    %31 = vector.broadcast %30 : vector<8x1xf32> to vector<8x128xf32>
    %32 = arith.subf %26, %31 : vector<8x128xf32>
    %33 = arith.mulf %32, %25 : vector<8x128xf32>
    %34 = arith.mulf %33, %33 : vector<8x128xf32>
    %cst_17 = arith.constant dense<0.000000e+00> : vector<8xf32>
    %35 = vector.multi_reduction <add>, %34, %cst_17 [1] : vector<8x128xf32> to vector<8xf32>
    %36 = vector.shape_cast %35 : vector<8xf32> to vector<8x1xf32>
    %cst_18 = arith.constant 3.125000e-02 : f32
    %37 = vector.broadcast %cst_18 : f32 to vector<8x1xf32>
    %38 = arith.mulf %36, %37 : vector<8x1xf32>
    %cst_19 = arith.constant 9.99999997E-7 : f32
    %39 = vector.broadcast %cst_19 : f32 to vector<8x1xf32>
    %40 = arith.addf %38, %39 : vector<8x1xf32>
    %41 = math.rsqrt %40 : vector<8x1xf32>
    %42 = vector.broadcast %41 : vector<8x1xf32> to vector<8x128xf32>
    %43 = arith.mulf %33, %42 : vector<8x128xf32>
    %c0_20 = arith.constant 0 : index
    %c0_21 = arith.constant 0 : index
    %44 = vector.load %arg7[%c0_20, %c0_21] : memref<1x128xf32, #tpu.memory_space<vmem>>, vector<1x128xf32>
    %45 = vector.broadcast %44 : vector<1x128xf32> to vector<8x128xf32>
    %46 = arith.mulf %43, %45 : vector<8x128xf32>
    %c0_22 = arith.constant 0 : index
    %c0_23 = arith.constant 0 : index
    %47 = vector.load %arg8[%c0_22, %c0_23] : memref<1x128xf32, #tpu.memory_space<vmem>>, vector<1x128xf32>
    %48 = vector.broadcast %47 : vector<1x128xf32> to vector<8x128xf32>
    %49 = arith.addf %46, %48 : vector<8x128xf32>
    %c0_24 = arith.constant 0 : index
    %c0_25 = arith.constant 0 : index
    %50 = vector.load %arg9[%c0_24, %c0_25] : memref<8x128xf32, #tpu.memory_space<vmem>>, vector<8x128xf32>
    tpu.vector_store %arg9[%c0_24, %c0_25], %49 {strides = array<i32>} : memref<8x128xf32, #tpu.memory_space<vmem>>, vector<8x128xf32>,
    return
  }
  func.func @transform_0(%arg0: i32, %arg1: i32) -> (i32, i32) {
    %c0_i32 = arith.constant 0 : i32
    %c0_i32_0 = arith.constant 0 : i32
    return %arg0, %c0_i32 : i32, i32
  }
  func.func @transform_1(%arg0: i32, %arg1: i32) -> (i32, i32) {
    %c0_i32 = arith.constant 0 : i32
    %c0_i32_0 = arith.constant 0 : i32
    %c0_i32_1 = arith.constant 0 : i32
    return %c0_i32, %c0_i32_0 : i32, i32
  }
  func.func @transform_2(%arg0: i32, %arg1: i32) -> (i32, i32) {
    %c0_i32 = arith.constant 0 : i32
    %c0_i32_0 = arith.constant 0 : i32
    %c0_i32_1 = arith.constant 0 : i32
    return %c0_i32, %c0_i32_0 : i32, i32
  }
  func.func @transform_3(%arg0: i32, %arg1: i32) -> (i32, i32) {
    %c0_i32 = arith.constant 0 : i32
    %c0_i32_0 = arith.constant 0 : i32
    %c0_i32_1 = arith.constant 0 : i32
    return %c0_i32, %c0_i32_0 : i32, i32
  }
  func.func @transform_4(%arg0: i32, %arg1: i32) -> (i32, i32) {
    %c0_i32 = arith.constant 0 : i32
    %c0_i32_0 = arith.constant 0 : i32
    %c0_i32_1 = arith.constant 0 : i32
    return %c0_i32, %c0_i32_0 : i32, i32
  }
  func.func @transform_5(%arg0: i32, %arg1: i32) -> (i32, i32) {
    %c0_i32 = arith.constant 0 : i32
    %c0_i32_0 = arith.constant 0 : i32
    %c0_i32_1 = arith.constant 0 : i32
    return %c0_i32, %c0_i32_0 : i32, i32
  }
  func.func @transform_6(%arg0: i32, %arg1: i32) -> (i32, i32) {
    %c0_i32 = arith.constant 0 : i32
    %c0_i32_0 = arith.constant 0 : i32
    %c0_i32_1 = arith.constant 0 : i32
    return %c0_i32, %c0_i32_0 : i32, i32
  }
  func.func @transform_7(%arg0: i32, %arg1: i32) -> (i32, i32) {
    %c0_i32 = arith.constant 0 : i32
    %c0_i32_0 = arith.constant 0 : i32
    return %arg0, %c0_i32 : i32, i32
  }
}

</mosaic_0001>

<bundles_post_ra>
// kernel: tpu_custom_call.1
= control target key start
LH: loop header
LB: loop body
LE: loop exit
PB: predicated region body
PF: predicated region fallthrough
CT: control target
= control target key end

     0   :  { %s1119_s0 = inlined_call_operand.hbm [shape: f32[16,128], index: 0, kind: input, shape index: {}]   ;;  %s1120_s1 = inlined_call_operand.hbm [shape: f32[128,128], index: 1, kind: input, shape index: {}]   ;;  %s1121_s2 = inlined_call_operand.vmem [shape: f32[1,128], index: 2, kind: input, shape index: {}]   ;;  %s1122_s3 = inlined_call_operand.hbm [shape: f32[128,128], index: 3, kind: input, shape index: {}]   ;;  %s1123_s4 = inlined_call_operand.vmem [shape: f32[1,128], index: 4, kind: input, shape index: {}]   ;;  %s1124_s5 = inlined_call_operand.vmem [shape: f32[1,128], index: 5, kind: input, shape index: {}]   ;;  %s1125_s6 = inlined_call_operand.vmem [shape: f32[1,128], index: 6, kind: input, shape index: {}]   ;;  %s1126_s7 = inlined_call_operand.hbm [shape: f32[16,128], index: 7, kind: output, shape index: {}]  }
   0x1   :  { %1127 = sst [smem:[#allocation12_spill]] %s1120_s1 }
   0x2   :  { %12 = vsyncpa [#allocation3], 0 }
   0x3   :  { %14 = vsyncpa [#allocation3 + $0x1], 0 }
   0x4   :  { %15 = vsyncpa [#allocation6], 0 }
   0x5   :  { %16 = vsyncpa [#allocation4], 0 }
   0x6   :  { %18 = vsyncpa [#allocation4 + $0x1], 0  ;;  %s952_s24 = smov 0   ;;  %s954_s25 = smov 0  }
   0x7   :  { %s956_s26 = smov 0   ;;  %s958_s27 = smov 0  }
   0x8   :  { %s960_s28 = smov 0   ;;  %s962_s29 = smov 0  }
   0x9 LB: > { %s616_s30 = sadd.s32 4294967295, %s905_s29   ;;  %p618_p0 = scmp.ge.s32.totalorder %s905_s29, 1  ;;  %s905_s29 = sphi %s962_s29, %s24_s29   ;;  %s901_s28 = sphi %s960_s28, %s1138_s28   ;;  %s897_s27 = sphi %s958_s27, %s1137_s27   ;;  %s893_s26 = sphi %s956_s26, %s1136_s26   ;;  %s889_s25 = sphi %s954_s25, %s1135_s25   ;;  %s885_s24 = sphi %s952_s24, %s1134_s24  }
   0xa   : > { %p986_p1 = scmp.eq.s32.totalorder %s616_s30, 0  ;;  %p219_p2 = scmp.lt.s32.totalorder %s905_s29, 3 }
   0xb   : > { %s1129_s1 = sld [smem:[#allocation12_spill]]  ;;  %s907_s13 = smov [#allocation5]  }
   0xc   : > { %p994_p3 = pnand %p618_p0, %p219_p2  ;;  %s232_s14 = sshll.u32 %s907_s13, 4  ;;  %s233_s14 = int_to_ptr.vmem [resolvable:$true] %s232_s14 }
   0xd   : > { %p621_p6 = scmp.ge.s32.totalorder %s905_s29, 2  ;;  %s247_s17 = sshll.u32 %s1122_s3, 4  ;;  %s248_s17 = int_to_ptr.hbm [resolvable:$true] %s247_s17 }
   0xe   : > { %p647_p4 = pneg %p994_p3  ;;  %s908_s18 = smov 128  }
   0xf   : > { %s909_s19 = smov 8   ;;  %s910_s20 = smov [#allocation7]  }
  0x10   : > { %p648_p5 = pnand %p647_p4, %p986_p1  ;;  %s249_s21 = sshll.u32 %s910_s20, 4  ;;  %s250_s21 = int_to_ptr.vmem [resolvable:$true] %s249_s21 }
  0x11   : > { %s230_s11 = sshll.u32 %s1129_s1, 4  ;;  %s36_s22 = sadd.s32 1, %s901_s28  ;;  %s231_s11 = int_to_ptr.hbm [resolvable:$true] %s230_s11 }
  0x12   : > { %650 = dma.hbm_to_vmem [thread:$0]  (!%p648_p5), %s231_s11, 2048, %s233_s14, [#allocation6], %s908_s18, %s908_s18, %s909_s19  }
  0x13   : > { %653 = dma.hbm_to_vmem [thread:$0]  (!%p648_p5), %s248_s17, 2048, %s250_s21, [#allocation6], %s908_s18, %s908_s18, %s909_s19  }
  0x14   : > { %s617_s23 = sadd.s32 4294967294, %s905_s29   ;;  %p38_p7 = scmp.ge.s32.totalorder %s36_s22, 2 }
  0x15   : > { %s43_s9 = sadd.s32 1, %s893_s26  ;;  %p50_p8 = scmp.ne.s32.totalorder %s893_s26, %s889_s25 }
  0x16   : > { %s1140_s22 = smov (%p38_p7, %s36_s22), 0  ;;  %p51_p9 = scmp.eq.s32.totalorder %s905_s29, 0 }
  0x17   : > { %p56_p10 = scmp.ne.s32.totalorder %s889_s25, %s885_s24  ;;  %s40_s10 = ssub.s32 %s901_s28, %s1140_s22 }
  0x18   : > { %p206_p11 = scmp.eq.s32.totalorder %s616_s30, 1  ;;  %p41_p12 = scmp.eq.s32.totalorder %s40_s10, 0 }
  0x19   : > { %p1022_p13 = por %p986_p1, %p56_p10  ;;  %p212_p2 = scmp.eq.s32.totalorder %s617_s23, 1 }
  0x1a   : > { %p1026_p0 = por %p206_p11, %p50_p8  ;;  %p52_p4 = por %p51_p9, %p50_p8 }
  0x1b   : > { %s1031_s14 = scalar_select %p41_p12, %s893_s26, %s43_s9  }
  0x1c   : > { %p1033_p5 = por %p212_p2, %p56_p10  ;;  %s272_s16 = sand.u32 1, %s893_s26  }
  0x1d   : > { %s623_s30 = sshll.u32 %s901_s28, 3  ;;  %p664_p7 = scmp.lt.s32.totalorder %s905_s29, 2 }
  0x1e   : > { %s622_s17 = sshll.u32 %s272_s16, 3  ;;  %s280_s20 = scalar_lea.hbm %s1119_s0, %s623_s30 }
  0x1f   : > { %s282_s21 = sshll.u32 %s280_s20, 4  ;;  %s276_s10 = scalar_lea.vmem [#allocation2], %s622_s17  ;;  %s283_s21 = int_to_ptr.hbm [resolvable:$true] %s282_s21 }
  0x20   : > { %s284_s1 = sshll.u32 %s276_s10, 4  ;;  %p655_p11 = pnand %p664_p7, %p52_p4  ;;  %s285_s1 = int_to_ptr.vmem [resolvable:$true] %s284_s1 }
  0x21   : > { %s273_s23 = scalar_lea.sflag [#allocation3], %s272_s16  ;;  %293 = sbr.rel (%p994_p3) target bundleno = 655 (0x28f), region = 48 }
  0x22   : > { %657 = dma.hbm_to_vmem [thread:$0]  (!%p655_p11), %s283_s21, 128, %s285_s1, %s273_s23  }
  0x23   : > { %s1046_s9 = sand.u32 (!%p994_p3), 1, %s889_s25  }
  0x24   : > { %s625_s18 = sshll.u32 (!%p994_p3), %s1046_s9, 3  ;;  %s296_s30 = scalar_lea.sflag (!%p994_p3), [#allocation3], %s1046_s9 }
  0x25   : > { %s1052_s17 = scalar_lea.vmem (!%p994_p3), [#allocation2], %s625_s18 }
  0x26   : > { %872 = dma.done.wait (%p1022_p13), %s296_s30, 128  }
  0x27   : > { %874 = vsyncadd (%p1022_p13), %s296_s30, 4294967168 }
  0x28   : > { %876 = dma.done.wait (%p986_p1), [#allocation6], 4096  }
  0x29   : > { %878 = vsyncadd (%p986_p1), [#allocation6], 4294963200  ;;  %v357_v0 = vld [vmem:[#allocation5 + $0x78] sm:$0xff]  ;;  %v356_v1 = vld [vmem:[#allocation5 + $0x70] sm:$0xff]  ;;  %s632_s16 = sshll.u32 %s897_s27, 3  ;;  %s340_s27 = scalar_lea.vmem [#allocation8], %s625_s18 }
  0x2a   : > { %362 = vmatpush.msra.mxu0 %v357_v0  ;;  %v355_v2 = vld [vmem:[#allocation5 + $0x68] sm:$0xff]  ;;  %v354_v3 = vld [vmem:[#allocation5 + $0x60] sm:$0xff]  ;;  %v353_v4 = vld [vmem:[#allocation5 + $0x58] sm:$0xff]  ;;  %s517_s23 = scalar_lea.hbm %s1126_s7, %s632_s16  ;;  %s519_s1 = sshll.u32 %s340_s27, 4  ;;  %s520_s1 = int_to_ptr.vmem [resolvable:$true] %s519_s1 }
  0x2b   : > { %v352_v5 = vld [vmem:[#allocation5 + $0x50] sm:$0xff]  ;;  %v351_v6 = vld [vmem:[#allocation5 + $0x48] sm:$0xff]  ;;  %v350_v7 = vld [vmem:[#allocation5 + $0x40] sm:$0xff]  ;;  %s521_s8 = sshll.u32 %s517_s23, 4  ;;  %s507_s12 = scalar_lea.sflag [#allocation4], %s1046_s9  ;;  %s522_s8 = int_to_ptr.hbm [resolvable:$true] %s521_s8 }
  0x2c   : > { %363 = vmatpush.msra.mxu0 %v356_v1  ;;  %v349_v8 = vld [vmem:[#allocation5 + $0x38] sm:$0xff]  ;;  %v348_v9 = vld [vmem:[#allocation5 + $0x30] sm:$0xff]  ;;  %v347_v10 = vld [vmem:[#allocation5 + $0x28] sm:$0xff]  ;;  %s833_s11 = sshra.s32 %s522_s8, 4  ;;  %s839_s21 = scalar_lea.hbm %s1126_s7, 16  ;;  %s834_s11 = int_to_ptr.hbm [resolvable:$true] %s833_s11 }
  0x2d   : > { %v346_v11 = vld [vmem:[#allocation5 + $0x20] sm:$0xff]  ;;  %v345_v12 = vld [vmem:[#allocation5 + $0x18] sm:$0xff]  ;;  %v344_v13 = vld [vmem:[#allocation5 + $0x10] sm:$0xff]  ;;  %s835_s16 = scalar_lea.hbm %s834_s11, 8  ;;  %p840_p9 = scmp.lt.s32.totalorder %s834_s11, %s1126_s7 }
  0x2e   : > { %364 = vmatpush.msra.mxu0 %v355_v2  ;;  %v343_v14 = vld [vmem:[#allocation5 + $0x8] sm:$0xff]  ;;  %v342_v15 = vld [vmem:[#allocation5] sm:$0xff]  ;;  %v1063_v16 = vld [vmem:[%s1052_s17] sm:$0xff]  ;;  %p836_p1 = scmp.ne.s32.totalorder %s834_s11, %s835_s16  ;;  %p841_p10 = scmp.lt.s32.totalorder %s839_s21, %s835_s16 }
  0x2f   : > { %v441_v17 = vld [vmem:[#allocation7 + $0x78] sm:$0xff]  ;;  %v440_v18 = vld [vmem:[#allocation7 + $0x70] sm:$0xff]  ;;  %v439_v19 = vld [vmem:[#allocation7 + $0x68] sm:$0xff] }
  0x30   : > { %365 = vmatpush.msra.mxu0 %v354_v3  ;;  %442 = vmatpush.msra.mxu1 %v441_v17  ;;  %v438_v20 = vld [vmem:[#allocation7 + $0x60] sm:$0xff]  ;;  %v721_v21 = vld [vmem:[%s1121_s2] ss:$0 sm:$0xff]  ;;  %v437_v22 = vld [vmem:[#allocation7 + $0x58] sm:$0xff]  ;;  %v911_v17 = vmov 0.0   ;;  %p837_p3 = pnand %p836_p1, %p1026_p0  ;;  %p842_p12 = por %p841_p10, %p840_p9 }
  0x31   : > { %v436_v23 = vld [vmem:[#allocation7 + $0x50] sm:$0xff]  ;;  %v435_v25 = vld [vmem:[#allocation7 + $0x48] sm:$0xff]  ;;  %v434_v27 = vld [vmem:[#allocation7 + $0x40] sm:$0xff] }
  0x32   : > { %366 = vmatpush.msra.mxu0 %v353_v4  ;;  %443 = vmatpush.msra.mxu1 %v440_v18  ;;  %v433_v29 = vld [vmem:[#allocation7 + $0x38] sm:$0xff]  ;;  %v432_v31 = vld [vmem:[#allocation7 + $0x30] sm:$0xff]  ;;  %v431_v33 = vld [vmem:[#allocation7 + $0x28] sm:$0xff]  ;;  %p838_p8 = pneg %p837_p3 }
  0x33   : > { %v430_v36 = vld [vmem:[#allocation7 + $0x20] sm:$0xff]  ;;  %v429_v39 = vld [vmem:[#allocation7 + $0x18] sm:$0xff]  ;;  %v428_v42 = vld [vmem:[#allocation7 + $0x10] sm:$0xff] }
  0x34   : > { %367 = vmatpush.msra.mxu0 %v352_v5  ;;  %444 = vmatpush.msra.mxu1 %v439_v19  ;;  %v427_v45 = vld [vmem:[#allocation7 + $0x8] sm:$0xff]  ;;  %v426_v47 = vld [vmem:[#allocation7] sm:$0xff]  ;;  %p843_p13 = pnand %p842_p12, %p838_p8 }
  0x36   : > { %368 = vmatpush.msra.mxu0 %v351_v6  ;;  %445 = vmatpush.msra.mxu1 %v438_v20 }
  0x38   : > { %369 = vmatpush.msra.mxu0 %v350_v7  ;;  %446 = vmatpush.msra.mxu1 %v437_v22 }
  0x3a   : > { %370 = vmatpush.msra.mxu0 %v349_v8  ;;  %447 = vmatpush.msra.mxu1 %v436_v23 }
  0x3c   : > { %371 = vmatpush.msra.mxu0 %v348_v9  ;;  %448 = vmatpush.msra.mxu1 %v435_v25 }
  0x3e   : > { %372 = vmatpush.msra.mxu0 %v347_v10  ;;  %449 = vmatpush.msra.mxu1 %v434_v27 }
  0x40   : > { %373 = vmatpush.msra.mxu0 %v346_v11  ;;  %450 = vmatpush.msra.mxu1 %v433_v29  ;;  %v468_v11 = vlaneseq }
  0x42   : > { %374 = vmatpush.msra.mxu0 %v345_v12  ;;  %451 = vmatpush.msra.mxu1 %v432_v31  ;;  %v469_v12 = vand.u32 127, %v468_v11 }
  0x44   : > { %375 = vmatpush.msra.mxu0 %v344_v13  ;;  %452 = vmatpush.msra.mxu1 %v431_v33  ;;  %v722_v13 = vld [vmem:[%s1123_s4] ss:$0 sm:$0xff]  ;;  %vm470_vm4 = vcmp.lt.s32.totalorder %v469_v12, 32 }
  0x45   : > { %v630_v18 = vsel %vm470_vm4, 1.0, %v911_v17 }
  0x46   : > { %376 = vmatpush.msra.mxu0 %v343_v14  ;;  %453 = vmatpush.msra.mxu1 %v430_v36 }
  0x48   : > { %377 = vmatpush.msra.mxu0 %v342_v15  ;;  %454 = vmatpush.msra.mxu1 %v429_v39 }
  0x49   : > { %378 = vmatmul.f32.vlgmr.msra.gmra.mxu0 %v1063_v16 }
  0x4a   : > { %455 = vmatpush.msra.mxu1 %v428_v42 }
  0x4c   : > { %456 = vmatpush.msra.mxu1 %v427_v45 }
  0x4e   : > { %457 = vmatpush.msra.mxu1 %v426_v47 }
  0xc6   : > { %v379_v24 = vpop.f32.mrf.mxu0 }
  0xc7   : > { %v380_v26 = vadd.f32 %v721_v21, %v379_v24 }
  0xc9   : > { %v383_v28 = vmul.f32 0.70710677, %v380_v26  ;;  %v382_v8 = vmul.f32 0.5, %v380_v26 }
  0xcb   : > { %v384_v30 = vmul.f32 %v383_v28, %v383_v28 }
  0xcd   : > { %v385_v32 = vmin.f32 %v384_v30, 16.0 }
  0xcf   : > { %v386_v34 = vmul.f32 2.1237322e-06, %v385_v32  ;;  %v397_v35 = vmul.f32 3.8918573e-05, %v385_v32 }
  0xd1   : > { %v387_v37 = vadd.f32 0.00028619796, %v386_v34  ;;  %v398_v38 = vadd.f32 0.001143296, %v397_v35  ;;  %v723_v34 = vld [vmem:[%s1124_s5] ss:$0 sm:$0xff] }
  0xd3   : > { %v388_v40 = vmul.f32 %v387_v37, %v385_v32  ;;  %v399_v41 = vmul.f32 %v398_v38, %v385_v32  ;;  %v724_v37 = vld [vmem:[%s1125_s6] ss:$0 sm:$0xff] }
  0xd5   : > { %v400_v43 = vadd.f32 0.014752088, %v399_v41  ;;  %v389_v44 = vadd.f32 0.0036580483, %v388_v40 }
  0xd7   : > { %v401_v46 = vmul.f32 %v400_v43, %v385_v32  ;;  %v390_v49 = vmul.f32 %v389_v44, %v385_v32 }
  0xd9   : > { %v402_v48 = vadd.f32 0.112945676, %v401_v46  ;;  %v391_v52 = vadd.f32 0.05243302, %v390_v49 }
  0xdb   : > { %v403_v50 = vmul.f32 %v402_v48, %v385_v32  ;;  %v392_v55 = vmul.f32 %v391_v52, %v385_v32 }
  0xdd   : > { %v404_v51 = vadd.f32 0.4994258, %v403_v50  ;;  %v393_v56 = vadd.f32 0.18741608, %v392_v55 }
  0xdf   : > { %v405_v53 = vmul.f32 %v404_v51, %v385_v32  ;;  %v394_v58 = vmul.f32 %v393_v56, %v385_v32 }
  0xe1   : > { %v406_v54 = vadd.f32 1.0, %v405_v53  ;;  %v395_v62 = vadd.f32 1.1283791, %v394_v58 }
  0xe3   : > { %725 = vrcp.f32 %v406_v54  ;;  %v418_v61 = vand.u32 2147483648, %v406_v54  ;;  %v416_v0 = vand.u32 2147483647, %v406_v54  ;;  %vm412_vm1 = vweird.f32 %v406_v54 }
  0xe4   : > { %v396_v3 = vmul.f32 %v395_v62, %v383_v28 }
  0xe5   : > { %v419_v2 = vor.u32 1.1754944e-38, %v418_v61  ;;  %vm417_vm3 = vcmp.eq.f32.partialorder %v416_v0, 8.507059e+37 }
  0xe9   : > { %v726_v57 = vpop.eup %725 }
  0xea   : > { %v408_v59 = vmul.f32 %v726_v57, %v406_v54  ;;  %vm413_vm0 = vweird.f32 %v726_v57 }
  0xeb   : > { %vm414_vm2 = vmor %vm412_vm1, %vm413_vm0 }
  0xec   : > { %v409_v60 = vsub.f32 1.0, %v408_v59 }
  0xee   : > { %v410_v63 = vmul.f32 %v726_v57, %v409_v60 }
  0xf0   : > { %v411_v1 = vadd.f32 %v726_v57, %v410_v63 }
  0xf2   : > { %v415_v4 = vsel %vm414_vm2, %v726_v57, %v411_v1 }
  0xf3   : > { %v420_v5 = vsel %vm417_vm3, %v419_v2, %v415_v4 }
  0xf4   : > { %v421_v6 = vmul.f32 %v420_v5, %v396_v3 }
  0xf6   : > { %v629_v7 = vclamps-f32 %v421_v6, 1.0 }
  0xf8   : > { %v424_v9 = vadd.f32 1.0, %v629_v7 }
  0xfa   : > { %v425_v10 = vmul.f32 %v424_v9, %v382_v8 }
  0xfc   : > { %458 = vmatmul.f32.vlgmr.msra.gmra.mxu1 %v425_v10 }
 0x179   : > { %v459_v14 = vpop.f32.mrf.mxu1 }
 0x17a   : > { %v463_v15 = vadd.f32 %v459_v14, %v1063_v16 }
 0x17c   : > { %v467_v19 = vadd.f32 %v722_v13, %v463_v15 }
 0x17e   : > { %v473_v20 = vmul.f32 %v630_v18, %v467_v19 }
 0x180   : > { %474 = vadd.xlane.f32.xlu0 %v473_v20 }
 0x1f3   : > { %v475_v21 = vpop.xlane.xlu0 %474 }
 0x1f4   : > { %v476_v22 = vmul.f32 0.03125, %v475_v21 }
 0x1f6   : > { %v477_v23 = vsub.f32 %v473_v20, %v476_v22 }
 0x1f8   : > { %v478_v24 = vmul.f32 %v630_v18, %v477_v23 }
 0x1fa   : > { %v479_v25 = vmul.f32 %v478_v24, %v478_v24 }
 0x1fc   : > { %480 = vadd.xlane.f32.xlu0 %v479_v25 }
 0x26f   : > { %v481_v26 = vpop.xlane.xlu0 %480 }
 0x270   : > { %v482_v27 = vmul.f32 0.03125, %v481_v26 }
 0x272   : > { %v483_v28 = vadd.f32 1e-06, %v482_v27 }
 0x274   : > { %727 = vrsqrt.f32 %v483_v28  ;;  %vm490_vm6 = vweird.f32 %v483_v28 }
 0x27a   : > { %v728_v29 = vpop.eup %727 }
 0x27b   : > { %v485_v30 = vmul.f32 %v728_v29, %v483_v28  ;;  %vm491_vm5 = vweird.f32 %v728_v29 }
 0x27c   : > { %vm492_vm7 = vmor %vm490_vm6, %vm491_vm5 }
 0x27d   : > { %v486_v16 = vmul.f32 %v728_v29, %v485_v30 }
 0x27f   : > { %v487_v31 = vmul.f32 0.5, %v486_v16 }
 0x281   : > { %v488_v32 = vsub.f32 1.5, %v487_v31 }
 0x283   : > { %v489_v33 = vmul.f32 %v728_v29, %v488_v32 }
 0x285   : > { %v493_v35 = vsel %vm492_vm7, %v728_v29, %v489_v33 }
 0x286   : > { %v494_v36 = vmul.f32 %v493_v35, %v478_v24 }
 0x288   : > { %v499_v38 = vmul.f32 %v723_v34, %v494_v36 }
 0x28a   : > { %v504_v39 = vadd.f32 %v724_v37, %v499_v38 }
 0x28c   : > { %505 = vst [vmem:[%s340_s27] sm:$0xff] %v504_v39 }
 0x28d   : > { %846 = shalt.err (!%p843_p13)
}
 0x28e   : > { %645 = dma.vmem_to_hbm [thread:$0]  (%p1026_p0), %s520_s1, 128, %s522_s8, %s507_s12  }
 0x28f PF: > { %s533_s9 = sand.u32 1, %s885_s24   ;;  %p659_p2 = pnand %p621_p6, %p1033_p5 }
 0x290   : > { %s534_s23 = scalar_lea.sflag [#allocation4], %s533_s9 }
 0x291   : > { %p660_p4 = pneg %p659_p2 }
 0x293   : > { %880 = dma.done.wait (%p660_p4), %s534_s23, 128  }
 0x294   : > { %882 = vsyncadd (%p660_p4), %s534_s23, 4294967168  ;;  %s24_s29 = sadd.s32 1, %s905_s29   ;;  %s1134_s24 = smov %s889_s25 }
 0x295   : > { %p21_p7 = scmp.ge.s32.totalorder %s24_s29, 4   ;;  %s1135_s25 = smov %s893_s26 }
 0x296   : > { %s1136_s26 = smov %s1031_s14  ;;  %s1137_s27 = smov %s901_s28 }
 0x297   : > { %s1138_s28 = smov %s1140_s22  ;;  %23 = sbr.rel (!%p21_p7) target bundleno = 9 (0x9), region = 101 }
 0x29c   :  { %540 = vsyncpa [#allocation3], 1 }
 0x29d   :  { %542 = vsyncpa [#allocation3 + $0x1], 1 }
 0x29e   :  { %543 = vsyncpa [#allocation6], 1 }
 0x29f   :  { %544 = vsyncpa [#allocation4], 1 }
 0x2a0   :  { %546 = vsyncpa [#allocation4 + $0x1], 1 }

</bundles_post_ra>
